<compile_context>
chip_gen: v7x
topology: tpu7x:2x2x1
jax: 0.10.0
libtpu: 0.0.40
codegen_flags: <defaults>
</compile_context>

<pallas_src>
import jax
import jax.numpy as jnp
from jax import lax
from jax.experimental import pallas as pl
from jax.experimental.pallas import tpu as pltpu


# ----------------------------------------------------------------------------
# Hardware / tiling heuristics
# ----------------------------------------------------------------------------
def _num_tensorcores():
    """2 for megacore chips (v4 / v5p / v7x), else 1. Heuristic on device_kind."""
    try:
        kind = jax.devices()[0].device_kind.lower()
    except Exception:
        return 1
    return 2 if any(t in kind for t in ("v4", "v5p", "v7")) else 1


def _vmem_capacity_bytes():
    try:
        return int(pltpu.get_tpu_info().vmem_capacity_bytes)
    except Exception:
        return 64 * 1024 * 1024          # conservative (v7x per-TC VMEM)


def _pick_tiling(T, B, H, gx_bytes, out_bytes, w_bytes, n_tc, vmem_budget):
    """Pick (batch_tile, time_chunk) so the streamed blocks fit the VMEM budget."""

    def per_step(bt):
        # double-buffered, both directions: gx chunk rows + per-direction out rows
        return 2 * 2 * bt * 4 * H * gx_bytes + 2 * 2 * bt * H * out_bytes

    def fixed(bt):
        # recurrent weights (2 dirs x 2 bufs), 4 state scratches, length mask
        return 2 * 2 * H * 4 * H * w_bytes + 4 * bt * H * 4 + 2 * bt * H * 4

    # One batch tile per TensorCore; tile must be == B or a multiple of 8
    # (the (8,128) BlockSpec rule on the second-to-last block dim).
    bt = B // n_tc if (n_tc > 1 and B % n_tc == 0) else B
    if bt != B and bt % 8 != 0:
        bt = B
    # Only shrink the batch tile if even a minimal 8-step time chunk cannot fit
    # VMEM (bigger bt == better MXU M utilization, so keep it large otherwise).
    while (fixed(bt) + 8 * per_step(bt) > vmem_budget
           and bt % 2 == 0 and (bt // 2) % 8 == 0):
        bt //= 2

    tc_max = max(8, (vmem_budget - fixed(bt)) // per_step(bt))
    Tc = int(min(T, tc_max))
    if Tc < T:
        # Prefer a divisor of T so the tail chunk is not a masked partial block.
        d = Tc
        while d > 8 and T % d:
            d -= 1
        if T % d == 0:
            Tc = d
    return bt, max(Tc, 1)


# ----------------------------------------------------------------------------
# Pallas kernel: one bidirectional LSTM layer, time-chunked, fwd+bwd fused
# ----------------------------------------------------------------------------
def _bilstm_kernel(gx_f_ref, gx_b_ref, len_ref, whf_ref, whb_ref,
                   outf_ref, outb_ref,
                   hf, cf, hb, cb):
    # gx_f_ref: (Tc, bt, 4H)  precomputed x@W_ih_fwd + b_fwd (chunk c)
    # gx_b_ref: (Tc, bt, 4H)  precomputed x@W_ih_bwd + b_bwd (chunk nc-1-c)
    # len_ref:  (bt, H) int32 sequence length, lane-broadcast
    # wh*_ref:  (H, 4H)       recurrent weights (transposed, gate order i,f,g,o)
    # outf_ref: (Tc, bt, H)   masked forward hidden states  (chunk c)
    # outb_ref: (Tc, bt, H)   masked backward hidden states (chunk nc-1-c)
    # hf/cf/hb/cb: (bt, H) f32 VMEM scratch states, carried across time chunks
    Tc = gx_f_ref.shape[0]
    H = hf.shape[1]
    mm_dtype = whf_ref.dtype
    c = pl.program_id(1)
    nc = pl.num_programs(1)

    @pl.when(c == 0)
    def _():
        hf[...] = jnp.zeros_like(hf)
        cf[...] = jnp.zeros_like(cf)
        hb[...] = jnp.zeros_like(hb)
        cb[...] = jnp.zeros_like(cb)

    # Loop-invariant loads hoisted out of the recurrence.
    wh_f = whf_ref[...]
    wh_b = whb_ref[...]
    lens = len_ref[...]                         # (bt, H) int32, lane-dense

    t0_f = c * Tc                               # global time of fwd chunk start
    t0_b = (nc - 1 - c) * Tc                    # global time of bwd chunk start

    def sig(x):                                 # 1 EUP push instead of exp + recip
        return 0.5 * jnp.tanh(0.5 * x) + 0.5

    def cell(gx, h, c_prev, wh):
        # gx already holds x@W_ih + b; only the recurrent matmul runs per step.
        gates = gx.astype(jnp.float32) + jnp.dot(
            h.astype(mm_dtype), wh, preferred_element_type=jnp.float32)
        i = sig(gates[:, 0 * H:1 * H])
        f = sig(gates[:, 1 * H:2 * H])
        g = jnp.tanh(gates[:, 2 * H:3 * H])
        o = sig(gates[:, 3 * H:4 * H])
        c_new = f * c_prev + i * g
        h_new = o * jnp.tanh(c_new)
        return h_new, c_new

    def body(s, carry):
        hf0, cf0, hb0, cb0 = carry
        tl_f = s                                # local fwd time in this chunk
        tl_b = Tc - 1 - s                       # local bwd time in this chunk
        mf = lens > (t0_f + tl_f)               # (bt, H) bool
        mb = lens > (t0_b + tl_b)

        # Two independent recurrent chains per iteration (fwd + bwd).
        hf_new, cf_new = cell(gx_f_ref[tl_f], hf0, cf0, wh_f)
        hb_new, cb_new = cell(gx_b_ref[tl_b], hb0, cb0, wh_b)

        # Padded frames -> 0 output (pack/pad_packed_sequence semantics).
        outf_ref[tl_f] = jnp.where(mf, hf_new, 0.0).astype(outf_ref.dtype)
        outb_ref[tl_b] = jnp.where(mb, hb_new, 0.0).astype(outb_ref.dtype)

        # State hold at padded frames (vselect blends).
        return (jnp.where(mf, hf_new, hf0), jnp.where(mf, cf_new, cf0),
                jnp.where(mb, hb_new, hb0), jnp.where(mb, cb_new, cb0))

    carry0 = (hf[...], cf[...], hb[...], cb[...])
    hf1, cf1, hb1, cb1 = lax.fori_loop(0, Tc, body, carry0)
    hf[...], cf[...], hb[...], cb[...] = hf1, cf1, hb1, cb1


def bilstm_layer_tm(x_tm, lens_bh, p, *, matmul_dtype=jnp.bfloat16):
    """One bidirectional LSTM layer, time-major. x_tm: (T, B, D) -> (T, B, H) f32."""
    T, B, D = x_tm.shape
    H = p["whf"].shape[0]
    store_dtype = matmul_dtype      # gx streams + per-direction outputs (bf16 fast path)

    # --- Hoisted input projection: one big MXU matmul per direction. ---------
    xm = x_tm.reshape(T * B, D).astype(matmul_dtype)
    gx_f = (jnp.dot(xm, p["wif"].astype(matmul_dtype),
                    preferred_element_type=jnp.float32) + p["bf"]
            ).astype(store_dtype).reshape(T, B, 4 * H)
    gx_b = (jnp.dot(xm, p["wib"].astype(matmul_dtype),
                    preferred_element_type=jnp.float32) + p["bb"]
            ).astype(store_dtype).reshape(T, B, 4 * H)
    wh_f = p["whf"].astype(matmul_dtype)
    wh_b = p["whb"].astype(matmul_dtype)

    # --- Tiling: one batch tile per TensorCore, time-chunked to fit VMEM. ----
    itemsize = jnp.dtype(store_dtype).itemsize
    w_itemsize = jnp.dtype(matmul_dtype).itemsize
    n_tc = _num_tensorcores()
    vmem_cap = _vmem_capacity_bytes()
    vmem_budget = int(vmem_cap * 0.6)            # leave headroom for compiler scratch
    bt, Tc = _pick_tiling(T, B, H, itemsize, itemsize, w_itemsize, n_tc, vmem_budget)
    nb = B // bt
    nc = (T + Tc - 1) // Tc

    cost = pl.CostEstimate(
        flops=2 * 2 * T * B * H * 4 * H,                      # recurrent matmuls
        transcendentals=2 * 5 * T * B * H,                    # 4 gate tanh + tanh(c)/dir
        bytes_accessed=(2 * T * B * 4 * H + 2 * T * B * H) * itemsize
                       + B * H * 4 + 2 * H * 4 * H * w_itemsize)

    out_f, out_b = pl.pallas_call(
        _bilstm_kernel,
        out_shape=(jax.ShapeDtypeStruct((T, B, H), store_dtype),
                   jax.ShapeDtypeStruct((T, B, H), store_dtype)),
        grid_spec=pltpu.PrefetchScalarGridSpec(
            num_scalar_prefetch=0,
            grid=(nb, nc),
            in_specs=[
                pl.BlockSpec((Tc, bt, 4 * H), lambda b, c: (c, b, 0)),      # gx_f
                pl.BlockSpec((Tc, bt, 4 * H),
                             lambda b, c, _nc=nc: (_nc - 1 - c, b, 0)),     # gx_b (reversed)
                pl.BlockSpec((bt, H), lambda b, c: (b, 0)),                 # lens
                pl.BlockSpec((H, 4 * H), lambda b, c: (0, 0)),              # wh_f
                pl.BlockSpec((H, 4 * H), lambda b, c: (0, 0)),              # wh_b
            ],
            out_specs=[
                pl.BlockSpec((Tc, bt, H), lambda b, c: (c, b, 0)),          # fwd out
                pl.BlockSpec((Tc, bt, H),
                             lambda b, c, _nc=nc: (_nc - 1 - c, b, 0)),     # bwd out
            ],
            scratch_shapes=[pltpu.VMEM((bt, H), jnp.float32) for _ in range(4)],
        ),
        compiler_params=pltpu.CompilerParams(
            dimension_semantics=("parallel", "arbitrary"),
            vmem_limit_bytes=int(min(vmem_cap, 128 * 1024 * 1024) * 0.9)),
        cost_estimate=cost,
    )(gx_f, gx_b, lens_bh, wh_f, wh_b)

    # enc_hidden_sum_fwd_bwd=True: sum forward and backward halves.
    return out_f.astype(jnp.float32) + out_b.astype(jnp.float32)


# ----------------------------------------------------------------------------
# Parameter init (deterministic, PyTorch nn.LSTM shapes, gate order i,f,g,o)
# ----------------------------------------------------------------------------
def init_rnn_encoder_params(key, feat_dim, num_framestacks, enc_hidden_size,
                            enc_num_layers):
    H = enc_hidden_size
    input_size = feat_dim * num_framestacks
    k = 1.0 / jnp.sqrt(jnp.float32(H))
    layers = []
    D = input_size
    for _ in range(enc_num_layers):
        keys = jax.random.split(key, 9)
        key = keys[0]

        def u(kk, shape):
            return jax.random.uniform(kk, shape, jnp.float32, -k, k)

        # PyTorch: weight_ih (4H, D), weight_hh (4H, H), bias_ih (4H,), bias_hh (4H,)
        w_ih_f, w_hh_f = u(keys[1], (4 * H, D)), u(keys[2], (4 * H, H))
        b_f = u(keys[3], (4 * H,)) + u(keys[4], (4 * H,))
        w_ih_b, w_hh_b = u(keys[5], (4 * H, D)), u(keys[6], (4 * H, H))
        b_b = u(keys[7], (4 * H,)) + u(keys[8], (4 * H,))
        layers.append({
            "wif": w_ih_f.T, "whf": w_hh_f.T, "bf": b_f[None, :],
            "wib": w_ih_b.T, "whb": w_hh_b.T, "bb": b_b[None, :],
        })
        D = H
    return layers


def rnn_encoder_forward(layer_params, xs, xlens, *, matmul_dtype=jnp.bfloat16):
    """RNNEncoder.forward with input_layer='none'. Returns (eouts, elens, eouts_inter)."""
    elens = xlens
    B, T, _ = xs.shape
    H = layer_params[0]["whf"].shape[0]
    # Single time-major transpose for the whole stack (not per layer).
    x_tm = jnp.transpose(xs, (1, 0, 2)).astype(jnp.float32)          # (T, B, D)
    lens_bh = jnp.broadcast_to(elens.astype(jnp.int32)[:, None], (B, H))
    for p in layer_params:
        x_tm = bilstm_layer_tm(x_tm, lens_bh, p, matmul_dtype=matmul_dtype)
        # nn.Dropout: identity in inference mode (dropout_enc_rate handled outside)
    eouts = jnp.transpose(x_tm, (1, 0, 2))                           # (B, T, H)
    return eouts, elens, None


# ----------------------------------------------------------------------------
# Pure-JAX reference (strict f32 LSTM, matches PyTorch packed-sequence semantics)
# ----------------------------------------------------------------------------
def _lstm_dir_ref(x_tm, mask_tm, wi, wh, b, reverse):
    B = x_tm.shape[1]
    H = wh.shape[0]

    def step(carry, inp):
        h, c = carry
        x_t, m = inp
        gates = x_t @ wi + h @ wh + b
        i = jax.nn.sigmoid(gates[:, :H])
        f = jax.nn.sigmoid(gates[:, H:2 * H])
        g = jnp.tanh(gates[:, 2 * H:3 * H])
        o = jax.nn.sigmoid(gates[:, 3 * H:])
        c_new = f * c + i * g
        h_new = o * jnp.tanh(c_new)
        h = m * h_new + (1.0 - m) * h
        c = m * c_new + (1.0 - m) * c
        return (h, c), h * m

    init = (jnp.zeros((B, H), jnp.float32), jnp.zeros((B, H), jnp.float32))
    _, ys = lax.scan(step, init, (x_tm, mask_tm), reverse=reverse)
    return ys


def rnn_encoder_forward_ref(layer_params, xs, xlens):
    elens = xlens
    for p in layer_params:
        B, T, _ = xs.shape
        x_tm = jnp.transpose(xs, (1, 0, 2)).astype(jnp.float32)
        mask = (jnp.arange(T)[:, None] < elens[None, :]).astype(jnp.float32)[..., None]
        fwd = _lstm_dir_ref(x_tm, mask, p["wif"], p["whf"], p["bf"], reverse=False)
        bwd = _lstm_dir_ref(x_tm, mask, p["wib"], p["whb"], p["bb"], reverse=True)
        xs = jnp.transpose(fwd + bwd, (1, 0, 2))
    return xs, elens, None


# ----------------------------------------------------------------------------
if __name__ == "__main__":
    # params: feat_dim=32, num_framestacks=1, enc_hidden_size=32, enc_num_layers=2,
    #         input_layer='none', enc_hidden_sum_fwd_bwd=True, dropout_enc_rate=0.0
    B, T = 2, 8
    feat_dim, num_framestacks = 32, 1
    enc_hidden_size, enc_num_layers = 32, 2

    key = jax.random.PRNGKey(0)
    kx, kp = jax.random.split(key)
    xs = jax.random.normal(kx, (B, T, feat_dim * num_framestacks), jnp.float32)
    xlens = jnp.array([T, T - 2], dtype=jnp.int32)

    layer_params = init_rnn_encoder_params(
        kp, feat_dim, num_framestacks, enc_hidden_size, enc_num_layers)

    ref_eouts, ref_elens, _ = rnn_encoder_forward_ref(layer_params, xs, xlens)

    # f32 matmul path: strict check against the PyTorch-equivalent reference.
    eouts32, elens, eouts_inter = rnn_encoder_forward(
        layer_params, xs, xlens, matmul_dtype=jnp.float32)
    eouts32 = jax.block_until_ready(eouts32)
    assert eouts32.shape == (B, T, enc_hidden_size)
    assert eouts_inter is None
    assert jnp.array_equal(elens, xlens)
    assert jnp.allclose(eouts32, ref_eouts, rtol=1e-4, atol=1e-4), "f32 mismatch vs reference"

    # bf16 matmul/storage path (MXU fast path): loose tolerance vs the f32 reference.
    eouts_bf16, _, _ = rnn_encoder_forward(
        layer_params, xs, xlens, matmul_dtype=jnp.bfloat16)
    eouts_bf16 = jax.block_until_ready(eouts_bf16)
    assert jnp.allclose(eouts_bf16, ref_eouts, rtol=5e-2, atol=5e-2), "bf16 mismatch vs reference"

    print("KERNEL_OK")
</pallas_src>

<mosaic_0001>
module attributes {stable_mosaic.version = 11 : i64} {
  func.func @_bilstm_kernel(%arg0: i32, %arg1: i32, %arg2: memref<8x2x128xf32, #tpu.memory_space<vmem>>, %arg3: memref<8x2x128xf32, #tpu.memory_space<vmem>>, %arg4: memref<2x32xi32, #tpu.memory_space<vmem>>, %arg5: memref<32x128xf32, #tpu.memory_space<vmem>>, %arg6: memref<32x128xf32, #tpu.memory_space<vmem>>, %arg7: memref<8x2x32xf32, #tpu.memory_space<vmem>>, %arg8: memref<8x2x32xf32, #tpu.memory_space<vmem>>, %arg9: memref<2x32xf32, #tpu.memory_space<vmem>>, %arg10: memref<2x32xf32, #tpu.memory_space<vmem>>, %arg11: memref<2x32xf32, #tpu.memory_space<vmem>>, %arg12: memref<2x32xf32, #tpu.memory_space<vmem>>) attributes {dimension_semantics = [#tpu.dimension_semantics<parallel>, #tpu.dimension_semantics<arbitrary>], iteration_bounds = array<i64: 1, 1>, scalar_prefetch = 0 : i64, scratch_operands = 4 : i64, tpu.core_type = #tpu.core_type<tc>, window_params = [{transform_indices = @transform_0, window_bounds = array<i64: 8, 2, 128>}, {transform_indices = @transform_1, window_bounds = array<i64: 8, 2, 128>}, {transform_indices = @transform_2, window_bounds = array<i64: 2, 32>}, {pipeline_mode = #tpu.pipeline_mode<synchronous>, transform_indices = @transform_3, window_bounds = array<i64: 32, 128>}, {pipeline_mode = #tpu.pipeline_mode<synchronous>, transform_indices = @transform_4, window_bounds = array<i64: 32, 128>}, {transform_indices = @transform_5, window_bounds = array<i64: 8, 2, 32>}, {transform_indices = @transform_6, window_bounds = array<i64: 8, 2, 32>}]} {
    %c0_i32 = arith.constant 0 : i32
    %0 = arith.cmpi eq, %arg1, %c0_i32 : i32
    %1 = arith.extui %0 : i1 to i32
    %c0_i32_0 = arith.constant 0 : i32
    %2 = arith.cmpi ne, %1, %c0_i32_0 : i32
    scf.if %2 {
      %cst = arith.constant 0.000000e+00 : f32
      %19 = vector.broadcast %cst : f32 to vector<2x32xf32>
      %c0_27 = arith.constant 0 : index
      %c0_28 = arith.constant 0 : index
      %20 = vector.load %arg9[%c0_27, %c0_28] : memref<2x32xf32, #tpu.memory_space<vmem>>, vector<2x32xf32>
      tpu.vector_store %arg9[%c0_27, %c0_28], %19 {strides = array<i32>} : memref<2x32xf32, #tpu.memory_space<vmem>>, vector<2x32xf32>,
      %cst_29 = arith.constant 0.000000e+00 : f32
      %21 = vector.broadcast %cst_29 : f32 to vector<2x32xf32>
      %c0_30 = arith.constant 0 : index
      %c0_31 = arith.constant 0 : index
      %22 = vector.load %arg10[%c0_30, %c0_31] : memref<2x32xf32, #tpu.memory_space<vmem>>, vector<2x32xf32>
      tpu.vector_store %arg10[%c0_30, %c0_31], %21 {strides = array<i32>} : memref<2x32xf32, #tpu.memory_space<vmem>>, vector<2x32xf32>,
      %cst_32 = arith.constant 0.000000e+00 : f32
      %23 = vector.broadcast %cst_32 : f32 to vector<2x32xf32>
      %c0_33 = arith.constant 0 : index
      %c0_34 = arith.constant 0 : index
      %24 = vector.load %arg11[%c0_33, %c0_34] : memref<2x32xf32, #tpu.memory_space<vmem>>, vector<2x32xf32>
      tpu.vector_store %arg11[%c0_33, %c0_34], %23 {strides = array<i32>} : memref<2x32xf32, #tpu.memory_space<vmem>>, vector<2x32xf32>,
      %cst_35 = arith.constant 0.000000e+00 : f32
      %25 = vector.broadcast %cst_35 : f32 to vector<2x32xf32>
      %c0_36 = arith.constant 0 : index
      %c0_37 = arith.constant 0 : index
      %26 = vector.load %arg12[%c0_36, %c0_37] : memref<2x32xf32, #tpu.memory_space<vmem>>, vector<2x32xf32>
      tpu.vector_store %arg12[%c0_36, %c0_37], %25 {strides = array<i32>} : memref<2x32xf32, #tpu.memory_space<vmem>>, vector<2x32xf32>,
    } else {
    }
    %c0 = arith.constant 0 : index
    %c0_1 = arith.constant 0 : index
    %3 = vector.load %arg5[%c0, %c0_1] : memref<32x128xf32, #tpu.memory_space<vmem>>, vector<32x128xf32>
    %c0_2 = arith.constant 0 : index
    %c0_3 = arith.constant 0 : index
    %4 = vector.load %arg6[%c0_2, %c0_3] : memref<32x128xf32, #tpu.memory_space<vmem>>, vector<32x128xf32>
    %c0_4 = arith.constant 0 : index
    %c0_5 = arith.constant 0 : index
    %5 = vector.load %arg4[%c0_4, %c0_5] : memref<2x32xi32, #tpu.memory_space<vmem>>, vector<2x32xi32>
    %c8_i32 = arith.constant 8 : i32
    %6 = arith.muli %arg1, %c8_i32 : i32
    %c0_i32_6 = arith.constant 0 : i32
    %7 = arith.subi %c0_i32_6, %arg1 : i32
    %c8_i32_7 = arith.constant 8 : i32
    %8 = arith.muli %7, %c8_i32_7 : i32
    %c0_8 = arith.constant 0 : index
    %c0_9 = arith.constant 0 : index
    %9 = vector.load %arg9[%c0_8, %c0_9] : memref<2x32xf32, #tpu.memory_space<vmem>>, vector<2x32xf32>
    %c0_10 = arith.constant 0 : index
    %c0_11 = arith.constant 0 : index
    %10 = vector.load %arg10[%c0_10, %c0_11] : memref<2x32xf32, #tpu.memory_space<vmem>>, vector<2x32xf32>
    %c0_12 = arith.constant 0 : index
    %c0_13 = arith.constant 0 : index
    %11 = vector.load %arg11[%c0_12, %c0_13] : memref<2x32xf32, #tpu.memory_space<vmem>>, vector<2x32xf32>
    %c0_14 = arith.constant 0 : index
    %c0_15 = arith.constant 0 : index
    %12 = vector.load %arg12[%c0_14, %c0_15] : memref<2x32xf32, #tpu.memory_space<vmem>>, vector<2x32xf32>
    %c0_i32_16 = arith.constant 0 : i32
    %c8_i32_17 = arith.constant 8 : i32
    %13 = arith.addi %c0_i32_16, %c8_i32_17 : i32
    %c1_i32 = arith.constant 1 : i32
    %14:4 = scf.for %arg13 = %c0_i32_16 to %13 step %c1_i32 iter_args(%arg14 = %9, %arg15 = %10, %arg16 = %11, %arg17 = %12) -> (vector<2x32xf32>, vector<2x32xf32>, vector<2x32xf32>, vector<2x32xf32>)  : i32 {
      %c7_i32 = arith.constant 7 : i32
      %19 = arith.subi %c7_i32, %arg13 : i32
      %20 = arith.addi %6, %arg13 : i32
      %21 = vector.broadcast %20 : i32 to vector<2x32xi32>
      %22 = arith.cmpi sgt, %5, %21 : vector<2x32xi32>
      %23 = arith.addi %8, %19 : i32
      %24 = vector.broadcast %23 : i32 to vector<2x32xi32>
      %25 = arith.cmpi sgt, %5, %24 : vector<2x32xi32>
      %26 = arith.index_cast %arg13 : i32 to index
      %c0_27 = arith.constant 0 : index
      %c0_28 = arith.constant 0 : index
      %27 = vector.load %arg2[%26, %c0_27, %c0_28] : memref<8x2x128xf32, #tpu.memory_space<vmem>>, vector<1x2x128xf32>
      %28 = vector.shape_cast %27 : vector<1x2x128xf32> to vector<2x128xf32>
      %cst = arith.constant dense<0.000000e+00> : vector<2x128xf32>
      %29 = tpu.matmul %arg14, %3, %cst {dimension_numbers = #tpu.dot_dimension_numbers<[1], [0], [0], [1], [0, 0, 1, 1], [], []>} : vector<2x32xf32>, vector<32x128xf32>, vector<2x128xf32> -> vector<2x128xf32>
      %30 = arith.addf %28, %29 : vector<2x128xf32>
      %31 = vector.extract_strided_slice %30 {offsets = [0, 0], sizes = [2, 32], strides = [1, 1]} : vector<2x128xf32> to vector<2x32xf32>
      %cst_29 = arith.constant 5.000000e-01 : f32
      %32 = vector.broadcast %cst_29 : f32 to vector<2x32xf32>
      %33 = arith.mulf %32, %31 : vector<2x32xf32>
      %34 = math.tanh %33 : vector<2x32xf32>
      %cst_30 = arith.constant 5.000000e-01 : f32
      %35 = vector.broadcast %cst_30 : f32 to vector<2x32xf32>
      %36 = arith.mulf %35, %34 : vector<2x32xf32>
      %cst_31 = arith.constant 5.000000e-01 : f32
      %37 = vector.broadcast %cst_31 : f32 to vector<2x32xf32>
      %38 = arith.addf %36, %37 : vector<2x32xf32>
      %39 = vector.extract_strided_slice %30 {offsets = [0, 32], sizes = [2, 32], strides = [1, 1]} : vector<2x128xf32> to vector<2x32xf32>
      %cst_32 = arith.constant 5.000000e-01 : f32
      %40 = vector.broadcast %cst_32 : f32 to vector<2x32xf32>
      %41 = arith.mulf %40, %39 : vector<2x32xf32>
      %42 = math.tanh %41 : vector<2x32xf32>
      %cst_33 = arith.constant 5.000000e-01 : f32
      %43 = vector.broadcast %cst_33 : f32 to vector<2x32xf32>
      %44 = arith.mulf %43, %42 : vector<2x32xf32>
      %cst_34 = arith.constant 5.000000e-01 : f32
      %45 = vector.broadcast %cst_34 : f32 to vector<2x32xf32>
      %46 = arith.addf %44, %45 : vector<2x32xf32>
      %47 = vector.extract_strided_slice %30 {offsets = [0, 64], sizes = [2, 32], strides = [1, 1]} : vector<2x128xf32> to vector<2x32xf32>
      %48 = math.tanh %47 : vector<2x32xf32>
      %49 = vector.extract_strided_slice %30 {offsets = [0, 96], sizes = [2, 32], strides = [1, 1]} : vector<2x128xf32> to vector<2x32xf32>
      %cst_35 = arith.constant 5.000000e-01 : f32
      %50 = vector.broadcast %cst_35 : f32 to vector<2x32xf32>
      %51 = arith.mulf %50, %49 : vector<2x32xf32>
      %52 = math.tanh %51 : vector<2x32xf32>
      %cst_36 = arith.constant 5.000000e-01 : f32
      %53 = vector.broadcast %cst_36 : f32 to vector<2x32xf32>
      %54 = arith.mulf %53, %52 : vector<2x32xf32>
      %cst_37 = arith.constant 5.000000e-01 : f32
      %55 = vector.broadcast %cst_37 : f32 to vector<2x32xf32>
      %56 = arith.addf %54, %55 : vector<2x32xf32>
      %57 = arith.mulf %46, %arg15 : vector<2x32xf32>
      %58 = arith.mulf %38, %48 : vector<2x32xf32>
      %59 = arith.addf %57, %58 : vector<2x32xf32>
      %60 = math.tanh %59 : vector<2x32xf32>
      %61 = arith.mulf %56, %60 : vector<2x32xf32>
      %62 = arith.index_cast %19 : i32 to index
      %c0_38 = arith.constant 0 : index
      %c0_39 = arith.constant 0 : index
      %63 = vector.load %arg3[%62, %c0_38, %c0_39] : memref<8x2x128xf32, #tpu.memory_space<vmem>>, vector<1x2x128xf32>
      %64 = vector.shape_cast %63 : vector<1x2x128xf32> to vector<2x128xf32>
      %cst_40 = arith.constant dense<0.000000e+00> : vector<2x128xf32>
      %65 = tpu.matmul %arg16, %4, %cst_40 {dimension_numbers = #tpu.dot_dimension_numbers<[1], [0], [0], [1], [0, 0, 1, 1], [], []>} : vector<2x32xf32>, vector<32x128xf32>, vector<2x128xf32> -> vector<2x128xf32>
      %66 = arith.addf %64, %65 : vector<2x128xf32>
      %67 = vector.extract_strided_slice %66 {offsets = [0, 0], sizes = [2, 32], strides = [1, 1]} : vector<2x128xf32> to vector<2x32xf32>
      %cst_41 = arith.constant 5.000000e-01 : f32
      %68 = vector.broadcast %cst_41 : f32 to vector<2x32xf32>
      %69 = arith.mulf %68, %67 : vector<2x32xf32>
      %70 = math.tanh %69 : vector<2x32xf32>
      %cst_42 = arith.constant 5.000000e-01 : f32
      %71 = vector.broadcast %cst_42 : f32 to vector<2x32xf32>
      %72 = arith.mulf %71, %70 : vector<2x32xf32>
      %cst_43 = arith.constant 5.000000e-01 : f32
      %73 = vector.broadcast %cst_43 : f32 to vector<2x32xf32>
      %74 = arith.addf %72, %73 : vector<2x32xf32>
      %75 = vector.extract_strided_slice %66 {offsets = [0, 32], sizes = [2, 32], strides = [1, 1]} : vector<2x128xf32> to vector<2x32xf32>
      %cst_44 = arith.constant 5.000000e-01 : f32
      %76 = vector.broadcast %cst_44 : f32 to vector<2x32xf32>
      %77 = arith.mulf %76, %75 : vector<2x32xf32>
      %78 = math.tanh %77 : vector<2x32xf32>
      %cst_45 = arith.constant 5.000000e-01 : f32
      %79 = vector.broadcast %cst_45 : f32 to vector<2x32xf32>
      %80 = arith.mulf %79, %78 : vector<2x32xf32>
      %cst_46 = arith.constant 5.000000e-01 : f32
      %81 = vector.broadcast %cst_46 : f32 to vector<2x32xf32>
      %82 = arith.addf %80, %81 : vector<2x32xf32>
      %83 = vector.extract_strided_slice %66 {offsets = [0, 64], sizes = [2, 32], strides = [1, 1]} : vector<2x128xf32> to vector<2x32xf32>
      %84 = math.tanh %83 : vector<2x32xf32>
      %85 = vector.extract_strided_slice %66 {offsets = [0, 96], sizes = [2, 32], strides = [1, 1]} : vector<2x128xf32> to vector<2x32xf32>
      %cst_47 = arith.constant 5.000000e-01 : f32
      %86 = vector.broadcast %cst_47 : f32 to vector<2x32xf32>
      %87 = arith.mulf %86, %85 : vector<2x32xf32>
      %88 = math.tanh %87 : vector<2x32xf32>
      %cst_48 = arith.constant 5.000000e-01 : f32
      %89 = vector.broadcast %cst_48 : f32 to vector<2x32xf32>
      %90 = arith.mulf %89, %88 : vector<2x32xf32>
      %cst_49 = arith.constant 5.000000e-01 : f32
      %91 = vector.broadcast %cst_49 : f32 to vector<2x32xf32>
      %92 = arith.addf %90, %91 : vector<2x32xf32>
      %93 = arith.mulf %82, %arg17 : vector<2x32xf32>
      %94 = arith.mulf %74, %84 : vector<2x32xf32>
      %95 = arith.addf %93, %94 : vector<2x32xf32>
      %96 = math.tanh %95 : vector<2x32xf32>
      %97 = arith.mulf %92, %96 : vector<2x32xf32>
      %cst_50 = arith.constant 0.000000e+00 : f32
      %98 = vector.broadcast %cst_50 : f32 to vector<2x32xf32>
      %99 = arith.select %22, %61, %98 : vector<2x32xi1>, vector<2x32xf32>
      %100 = arith.index_cast %arg13 : i32 to index
      %c0_51 = arith.constant 0 : index
      %c0_52 = arith.constant 0 : index
      %101 = vector.load %arg7[%100, %c0_51, %c0_52] : memref<8x2x32xf32, #tpu.memory_space<vmem>>, vector<1x2x32xf32>
      %102 = vector.shape_cast %101 : vector<1x2x32xf32> to vector<2x32xf32>
      %103 = vector.shape_cast %99 : vector<2x32xf32> to vector<1x2x32xf32>
      tpu.vector_store %arg7[%100, %c0_51, %c0_52], %103 {strides = array<i32>} : memref<8x2x32xf32, #tpu.memory_space<vmem>>, vector<1x2x32xf32>,
      %cst_53 = arith.constant 0.000000e+00 : f32
      %104 = vector.broadcast %cst_53 : f32 to vector<2x32xf32>
      %105 = arith.select %25, %97, %104 : vector<2x32xi1>, vector<2x32xf32>
      %106 = arith.index_cast %19 : i32 to index
      %c0_54 = arith.constant 0 : index
      %c0_55 = arith.constant 0 : index
      %107 = vector.load %arg8[%106, %c0_54, %c0_55] : memref<8x2x32xf32, #tpu.memory_space<vmem>>, vector<1x2x32xf32>
      %108 = vector.shape_cast %107 : vector<1x2x32xf32> to vector<2x32xf32>
      %109 = vector.shape_cast %105 : vector<2x32xf32> to vector<1x2x32xf32>
      tpu.vector_store %arg8[%106, %c0_54, %c0_55], %109 {strides = array<i32>} : memref<8x2x32xf32, #tpu.memory_space<vmem>>, vector<1x2x32xf32>,
      %110 = arith.select %22, %61, %arg14 : vector<2x32xi1>, vector<2x32xf32>
      %111 = arith.select %22, %59, %arg15 : vector<2x32xi1>, vector<2x32xf32>
      %112 = arith.select %25, %97, %arg16 : vector<2x32xi1>, vector<2x32xf32>
      %113 = arith.select %25, %95, %arg17 : vector<2x32xi1>, vector<2x32xf32>
      scf.yield %110, %111, %112, %113 : vector<2x32xf32>, vector<2x32xf32>, vector<2x32xf32>, vector<2x32xf32>
    }
    %c8_i32_18 = arith.constant 8 : i32
    %c0_19 = arith.constant 0 : index
    %c0_20 = arith.constant 0 : index
    %15 = vector.load %arg9[%c0_19, %c0_20] : memref<2x32xf32, #tpu.memory_space<vmem>>, vector<2x32xf32>
    tpu.vector_store %arg9[%c0_19, %c0_20], %14#0 {strides = array<i32>} : memref<2x32xf32, #tpu.memory_space<vmem>>, vector<2x32xf32>,
    %c0_21 = arith.constant 0 : index
    %c0_22 = arith.constant 0 : index
    %16 = vector.load %arg10[%c0_21, %c0_22] : memref<2x32xf32, #tpu.memory_space<vmem>>, vector<2x32xf32>
    tpu.vector_store %arg10[%c0_21, %c0_22], %14#1 {strides = array<i32>} : memref<2x32xf32, #tpu.memory_space<vmem>>, vector<2x32xf32>,
    %c0_23 = arith.constant 0 : index
    %c0_24 = arith.constant 0 : index
    %17 = vector.load %arg11[%c0_23, %c0_24] : memref<2x32xf32, #tpu.memory_space<vmem>>, vector<2x32xf32>
    tpu.vector_store %arg11[%c0_23, %c0_24], %14#2 {strides = array<i32>} : memref<2x32xf32, #tpu.memory_space<vmem>>, vector<2x32xf32>,
    %c0_25 = arith.constant 0 : index
    %c0_26 = arith.constant 0 : index
    %18 = vector.load %arg12[%c0_25, %c0_26] : memref<2x32xf32, #tpu.memory_space<vmem>>, vector<2x32xf32>
    tpu.vector_store %arg12[%c0_25, %c0_26], %14#3 {strides = array<i32>} : memref<2x32xf32, #tpu.memory_space<vmem>>, vector<2x32xf32>,
    return
  }
  func.func @transform_0(%arg0: i32, %arg1: i32) -> (i32, i32, i32) {
    %c0_i32 = arith.constant 0 : i32
    %c0_i32_0 = arith.constant 0 : i32
    return %arg1, %arg0, %c0_i32 : i32, i32, i32
  }
  func.func @transform_1(%arg0: i32, %arg1: i32) -> (i32, i32, i32) {
    %c0_i32 = arith.constant 0 : i32
    %0 = arith.subi %c0_i32, %arg1 : i32
    %c0_i32_0 = arith.constant 0 : i32
    %c0_i32_1 = arith.constant 0 : i32
    return %0, %arg0, %c0_i32_0 : i32, i32, i32
  }
  func.func @transform_2(%arg0: i32, %arg1: i32) -> (i32, i32) {
    %c0_i32 = arith.constant 0 : i32
    %c0_i32_0 = arith.constant 0 : i32
    return %arg0, %c0_i32 : i32, i32
  }
  func.func @transform_3(%arg0: i32, %arg1: i32) -> (i32, i32) {
    %c0_i32 = arith.constant 0 : i32
    %c0_i32_0 = arith.constant 0 : i32
    %c0_i32_1 = arith.constant 0 : i32
    return %c0_i32, %c0_i32_0 : i32, i32
  }
  func.func @transform_4(%arg0: i32, %arg1: i32) -> (i32, i32) {
    %c0_i32 = arith.constant 0 : i32
    %c0_i32_0 = arith.constant 0 : i32
    %c0_i32_1 = arith.constant 0 : i32
    return %c0_i32, %c0_i32_0 : i32, i32
  }
  func.func @transform_5(%arg0: i32, %arg1: i32) -> (i32, i32, i32) {
    %c0_i32 = arith.constant 0 : i32
    %c0_i32_0 = arith.constant 0 : i32
    return %arg1, %arg0, %c0_i32 : i32, i32, i32
  }
  func.func @transform_6(%arg0: i32, %arg1: i32) -> (i32, i32, i32) {
    %c0_i32 = arith.constant 0 : i32
    %0 = arith.subi %c0_i32, %arg1 : i32
    %c0_i32_0 = arith.constant 0 : i32
    %c0_i32_1 = arith.constant 0 : i32
    return %0, %arg0, %c0_i32_0 : i32, i32, i32
  }
}

</mosaic_0001>

<bundles_post_ra>
// kernel: tpu_custom_call.1
= control target key start
LH: loop header
LB: loop body
LE: loop exit
PB: predicated region body
PF: predicated region fallthrough
CT: control target
= control target key end

     0   :  { %12 = vsyncpa [#allocation7], 0  ;;  %s995_s0 = inlined_call_operand.hbm [shape: f32[8,2,128], index: 0, kind: input, shape index: {}]   ;;  %s996_s1 = inlined_call_operand.hbm [shape: f32[8,2,128], index: 1, kind: input, shape index: {}]   ;;  %s997_s2 = inlined_call_operand.vmem [shape: s32[2,32], index: 2, kind: input, shape index: {}]   ;;  %s998_s3 = inlined_call_operand.hbm [shape: f32[32,128], index: 3, kind: input, shape index: {}]   ;;  %s999_s4 = inlined_call_operand.hbm [shape: f32[32,128], index: 4, kind: input, shape index: {}]   ;;  %s1000_s5 = inlined_call_operand.hbm [shape: f32[8,2,32], index: 5, kind: output, shape index: {0}]   ;;  %s1001_s6 = inlined_call_operand.hbm [shape: f32[8,2,32], index: 6, kind: output, shape index: {1}]  }
   0x1   :  { %13 = vsyncpa [#allocation10], 0 }
   0x2   :  { %14 = vsyncpa [#allocation13], 0 }
   0x3   :  { %15 = vsyncpa [#allocation8], 0 }
   0x4   :  { %16 = vsyncpa [#allocation16], 0  ;;  %s735_s21 = smov [#allocation9]   ;;  %s736_s23 = smov [#allocation6]  }
   0x5   :  { %s38_s22 = sshll.u32 %s735_s21, 4  ;;  %s22_s24 = sshll.u32 %s736_s23, 4  ;;  %s39_s22 = int_to_ptr.vmem [resolvable:$true] %s38_s22  ;;  %s787_s24 = int_to_ptr.vmem [resolvable:$true] %s22_s24 }
   0x6   :  { %s553_s27 = scalar_lea.hbm %s996_s1, 256 }
   0x7   :  { %p554_p0 = scmp.ne.s32.totalorder %s996_s1, %s553_s27  ;;  %p557_p1 = scmp.lt.u32.totalorder %s553_s27, %s996_s1 }
   0x9   :  { %p559_p2 = pnand %p557_p1, %p554_p0 }
   0xb   :  { %562 = shalt.err (!%p559_p2)
}
   0xc   :  { %s563_s8 = scalar_lea.vmem %s39_s22, 256  ;;  %p568_p4 = scmp.lt.s32.totalorder %s39_s22, %s39_s22 }
   0xd   :  { %p564_p3 = scmp.ne.s32.totalorder %s39_s22, %s563_s8  ;;  %p569_p5 = scmp.lt.s32.totalorder %s563_s8, %s563_s8 }
   0xf   :  { %p570_p6 = por %p569_p5, %p568_p4 }
  0x11   :  { %p571_p7 = pnand %p570_p6, %p564_p3 }
  0x13   :  { %574 = shalt.err (!%p571_p7)
}
  0x14   :  { %s737_s9 = smov 32   ;;  %s738_s10 = smov 2  }
  0x15   :  { %44 = dma.hbm_to_vmem [thread:$0]  %s996_s1, 256, %s39_s22, [#allocation10], %s737_s9, %s737_s9, %s738_s10  }
  0x16   :  { %s575_s15 = scalar_lea.hbm %s995_s0, 256 }
  0x17   :  { %p576_p8 = scmp.ne.s32.totalorder %s995_s0, %s575_s15  ;;  %p579_p9 = scmp.lt.u32.totalorder %s575_s15, %s995_s0 }
  0x19   :  { %p581_p10 = pnand %p579_p9, %p576_p8 }
  0x1b   :  { %584 = shalt.err (!%p581_p10)
}
  0x1c   :  { %s585_s20 = scalar_lea.vmem %s787_s24, 256  ;;  %p590_p12 = scmp.lt.s32.totalorder %s787_s24, %s787_s24 }
  0x1d   :  { %p586_p11 = scmp.ne.s32.totalorder %s787_s24, %s585_s20  ;;  %p591_p13 = scmp.lt.s32.totalorder %s585_s20, %s585_s20 }
  0x1f   :  { %p592_p0 = por %p591_p13, %p590_p12 }
  0x21   :  { %p593_p1 = pnand %p592_p0, %p586_p11 }
  0x23   :  { %596 = shalt.err (!%p593_p1)
}
  0x24   :  { %28 = dma.hbm_to_vmem [thread:$0]  %s995_s0, 256, %s787_s24, [#allocation7], %s737_s9, %s737_s9, %s738_s10  }
  0x25   :  { %s739_s22 = smov [#allocation11]   ;;  %s597_s27 = scalar_lea.hbm %s998_s3, 512 }
  0x26   :  { %s52_s23 = sshll.u32 %s739_s22, 4  ;;  %p598_p2 = scmp.ne.s32.totalorder %s998_s3, %s597_s27  ;;  %s53_s23 = int_to_ptr.vmem [resolvable:$true] %s52_s23 }
  0x27   :  { %p601_p3 = scmp.lt.u32.totalorder %s597_s27, %s998_s3 }
  0x29   :  { %p603_p4 = pnand %p601_p3, %p598_p2 }
  0x2b   :  { %606 = shalt.err (!%p603_p4)
}
  0x2c   :  { %s607_s8 = scalar_lea.vmem %s53_s23, 512  ;;  %p612_p6 = scmp.lt.s32.totalorder %s53_s23, %s53_s23 }
  0x2d   :  { %p608_p5 = scmp.ne.s32.totalorder %s53_s23, %s607_s8  ;;  %p613_p7 = scmp.lt.s32.totalorder %s607_s8, %s607_s8 }
  0x2f   :  { %p614_p8 = por %p613_p7, %p612_p6 }
  0x31   :  { %p615_p9 = pnand %p614_p8, %p608_p5 }
  0x33   :  { %618 = shalt.err (!%p615_p9)
}
  0x34   :  { %s740_s0 = smov 128   ;;  %s741_s24 = smov 8  }
  0x35   :  { %58 = dma.hbm_to_vmem [thread:$0]  %s998_s3, 512, %s53_s23, [#allocation10], %s740_s0, %s740_s0, %s741_s24  }
  0x36   :  { %s742_s13 = smov [#allocation12]   ;;  %s619_s17 = scalar_lea.hbm %s999_s4, 512 }
  0x37   :  { %s64_s14 = sshll.u32 %s742_s13, 4  ;;  %p620_p10 = scmp.ne.s32.totalorder %s999_s4, %s619_s17  ;;  %s65_s14 = int_to_ptr.vmem [resolvable:$true] %s64_s14 }
  0x38   :  { %p623_p11 = scmp.lt.u32.totalorder %s619_s17, %s999_s4 }
  0x3a   :  { %p625_p12 = pnand %p623_p11, %p620_p10 }
  0x3c   :  { %628 = shalt.err (!%p625_p12)
}
  0x3d   :  { %s629_s21 = scalar_lea.vmem %s65_s14, 512  ;;  %p634_p0 = scmp.lt.s32.totalorder %s65_s14, %s65_s14 }
  0x3e   :  { %p630_p13 = scmp.ne.s32.totalorder %s65_s14, %s629_s21  ;;  %p635_p1 = scmp.lt.s32.totalorder %s629_s21, %s629_s21 }
  0x40   :  { %p636_p2 = por %p635_p1, %p634_p0 }
  0x42   :  { %p637_p3 = pnand %p636_p2, %p630_p13 }
  0x44   :  { %640 = shalt.err (!%p637_p3)
}
  0x45   :  { %70 = dma.hbm_to_vmem [thread:$0]  %s999_s4, 512, %s65_s14, [#allocation13], %s740_s0, %s740_s0, %s741_s24  }
  0x46   :  { %705 = dma.done.wait [#allocation7], 256  }
  0x47   :  { %706 = vsyncadd [#allocation7], 4294967040 }
  0x48   :  { %707 = dma.done.wait [#allocation10], 768  }
  0x49   :  { %708 = vsyncadd [#allocation10], 4294966528 }
  0x4a   :  { %709 = dma.done.wait [#allocation13], 512  }
  0x4b   :  { %710 = vsyncadd [#allocation13], 4294966784  ;;  %vm91_vm0 = vcmask 254976   ;;  %v743_v0 = vmov 0.0   ;;  %v852_v1 = vld [vmem:[#allocation11] sm:$0xff]  ;;  %v854_v2 = vld [vmem:[#allocation11 + $0x8] sm:$0xff] }
  0x4c   :  { %92 = vst.msk [vmem:[#allocation2] sm:$0x3] %vm91_vm0, %v743_v0  ;;  %93 = vst.msk [vmem:[#allocation3] sm:$0x3] %vm91_vm0, %v743_v0  ;;  %v856_v3 = vld [vmem:[#allocation11 + $0x10] sm:$0xff]  ;;  %v858_v4 = vld [vmem:[#allocation11 + $0x18] sm:$0xff] }
  0x4d   :  { %94 = vst.msk [vmem:[#allocation4] sm:$0x3] %vm91_vm0, %v743_v0  ;;  %95 = vst.msk [vmem:[#allocation5] sm:$0x3] %vm91_vm0, %v743_v0  ;;  %v860_v5 = vld [vmem:[#allocation12] sm:$0xff]  ;;  %v862_v6 = vld [vmem:[#allocation12 + $0x8] sm:$0xff] }
  0x4e   :  { %v864_v7 = vld [vmem:[#allocation12 + $0x10] sm:$0xff]  ;;  %v866_v8 = vld [vmem:[#allocation12 + $0x18] sm:$0xff]  ;;  %s881_s25 = smov 0  }
  0x4f   :  { %v871_v9 = vld [vmem:[%s997_s2] sm:$0x3] }
  0x53   :  { %v108_v10 = vld [vmem:[#allocation2] sm:$0x3]   ;;  %v109_v11 = vld [vmem:[#allocation3] sm:$0x3]  }
  0x54   :  { %v110_v12 = vld [vmem:[#allocation4] sm:$0x3]   ;;  %v111_v13 = vld [vmem:[#allocation5] sm:$0x3]  }
  0x55 LB: > { %v473_v14 = vpack.c.bf16 %v854_v2, %v852_v1  ;;  %v479_v15 = vpack.c.bf16 %v862_v6, %v860_v5  ;;  %v744_v16 = vmov 0.0|0.0   ;;  %v476_v17 = vpack.c.bf16 %v858_v4, %v856_v3  ;;  %s747_s2 = smov 32   ;;  %s122_s26 = ssub.s32 7, %s733_s25  ;;  %s733_s25 = sphi %s881_s25, %s117_s25   ;;  %v729_v10 = vphi %v108_v10, %v1005_v10   ;;  %v725_v11 = vphi %v109_v11, %v1004_v11   ;;  %v721_v12 = vphi %v110_v12, %v1003_v12   ;;  %v717_v13 = vphi %v111_v13, %v1002_v13  }
  0x56   : > { %472 = vmatprep.subr.bf16.mxu0 %v744_v16  ;;  %478 = vmatprep.subr.bf16.mxu1 %v744_v16  ;;  %v482_v18 = vpack.c.bf16 %v866_v8, %v864_v7  ;;  %vm745_vm1 = vmmov 0   ;;  %v746_v19 = vmov 0.0   ;;  %vm132_vm2 = vcmask 261120   ;;  %s436_s27 = sshll.u32 %s733_s25, 1  ;;  %s916_s28 = sshll.u32 %s122_s26, 1 }
  0x57   : > { %474 = vmatpush3.bf16.msra.mxu0 %v473_v14  ;;  %480 = vmatpush3.bf16.msra.mxu1 %v479_v15  ;;  %s130_s29 = scalar_lea.vmem [#allocation6], %s436_s27  ;;  %s234_s30 = scalar_lea.vmem [#allocation9], %s916_s28  ;;  %v124_v56 = vstv %s733_s25  ;;  %v127_v57 = vstv %s122_s26 }
  0x58   : > { %475 = vmatprep.subr.bf16.mxu0 %v744_v16  ;;  %458 = vmatprep.mubr.msk.f32.mxu0 %vm745_vm1, %v746_v19  ;;  %v131_v20 = vld [vmem:[%s130_s29] sm:$0x3]  ;;  %s748_s7 = smov 64   ;;  %s749_s8 = smov 96   ;;  %vm125_vm3 = vcmp.gt.s32.totalorder %v871_v9, %v124_v56  ;;  %vm128_vm4 = vcmp.gt.s32.totalorder %v871_v9, %v127_v57 }
  0x59   : > { %481 = vmatprep.subr.bf16.mxu1 %v744_v16  ;;  %469 = vmatprep.mubr.msk.f32.mxu1 %vm745_vm1, %v746_v19  ;;  %v235_v21 = vld [vmem:[%s234_s30] sm:$0x3]  ;;  %s341_s0 = scalar_lea.vmem [#allocation14], %s436_s27  ;;  %s349_s24 = scalar_lea.vmem [#allocation15], %s916_s28 }
  0x5a   : > { %213 = vrot.lane.b32.xlu1 %v725_v11, %s747_s2  ;;  %s117_s25 = sadd.s32 1, %s733_s25  }
  0x5b   : > { %477 = vmatpush3.bf16.msra.mxu0 %v476_v17  ;;  %483 = vmatpush3.bf16.msra.mxu1 %v482_v18  ;;  %p114_p4 = scmp.ge.s32.totalorder %s117_s25, 8  }
  0x5c   :  { %s750_s11 = smov (%p114_p4), [#allocation14]   ;;  %s751_s13 = smov (%p114_p4), [#allocation15]  }
  0x5d   :  { %s373_s12 = sshll.u32 (%p114_p4), %s750_s11, 4  ;;  %s389_s14 = sshll.u32 (%p114_p4), %s751_s13, 4  ;;  %s374_s12 = int_to_ptr.vmem [resolvable:$true] %s373_s12  ;;  %s958_s14 = int_to_ptr.vmem [resolvable:$true] %s389_s14 }
  0x5e   : > { %459 = vmatmul.mubr.msk.f32.vlgmr.msra.gmra.mrb[0].mxu0 %vm132_vm2, %v729_v10  ;;  %470 = vmatmul.mubr.msk.f32.vlgmr.msra.gmra.mrb[0].mxu1 %vm132_vm2, %v721_v12  ;;  %s641_s15 = scalar_lea.vmem (%p114_p4), %s374_s12, 256  ;;  %p646_p6 = scmp.lt.s32.totalorder (%p114_p4), %s374_s12, %s374_s12 }
  0x5f   : > { %316 = vrot.lane.b32.xlu1 %v717_v13, %s747_s2  ;;  %p642_p5 = scmp.ne.s32.totalorder (%p114_p4), %s374_s12, %s641_s15  ;;  %p647_p7 = scmp.lt.s32.totalorder (%p114_p4), %s641_s15, %s641_s15 }
  0x61   :  { %p648_p8 = por (%p114_p4), %p647_p7, %p646_p6 }
  0x63   :  { %p649_p9 = pnand (%p114_p4), %p648_p8, %p642_p5 }
  0xcc   : > { %v214_v42 = vpop.permute.xlu1 %213 }
  0xd1   : > { %v317_v44 = vpop.permute.xlu1 %316 }
 0x131   : > { %v202_v22 = vpop.f32.mrb[0].mxu0  ;;  %v305_v23 = vpop.f32.mrb[0].mxu1 }
 0x132   : > { %v206_v24 = vadd.f32 %v202_v22, %v131_v20  ;;  %v460_v25 = vpop.f32.mrb[1].mxu0  ;;  %v309_v26 = vadd.f32 %v305_v23, %v235_v21  ;;  %v471_v27 = vpop.f32.mrb[1].mxu1 }
 0x134   : > { %541 = vtanh.f32 %v206_v24  ;;  %v207_v30 = vmul.f32 0.5, %v206_v24  ;;  %v310_v31 = vmul.f32 0.5, %v309_v26 }
 0x135   : > { %543 = vtanh.f32 %v309_v26 }
 0x136   : > { %545 = vtanh.f32 %v207_v30 }
 0x137   : > { %547 = vtanh.f32 %v310_v31 }
 0x13e   : > { %v542_v28 = vpop.eup %541 }
 0x13f   : > { %218 = vrot.lane.b32.xlu0 %v542_v28, %s748_s7  ;;  %v544_v29 = vpop.eup %543 }
 0x140   : > { %v546_v32 = vpop.eup %545 }
 0x141   : > { %v209_v33 = vmul.f32 0.5, %v546_v32  ;;  %v548_v34 = vpop.eup %547 }
 0x142   : > { %v312_v36 = vmul.f32 0.5, %v548_v34 }
 0x143   : > { %321 = vrot.lane.b32.xlu0 %v544_v29, %s748_s7  ;;  %v210_v35 = vadd.f32 0.5, %v209_v33 }
 0x144   : > { %v313_v39 = vadd.f32 0.5, %v312_v36 }
 0x145   : > { %v216_v43 = vmul.f32 %v214_v42, %v210_v35 }
 0x146   : > { %v319_v47 = vmul.f32 %v317_v44, %v313_v39 }
 0x1b1   : > { %v219_v37 = vpop.permute.xlu0 %218 }
 0x1b2   : > { %v221_v38 = vmul.f32 %v219_v37, %v210_v35 }
 0x1b4   : > { %223 = vrot.lane.b32.xlu0 %v221_v38, %s747_s2 }
 0x1b5   : > { %v322_v40 = vpop.permute.xlu0 %321 }
 0x1b6   : > { %v324_v41 = vmul.f32 %v322_v40, %v313_v39 }
 0x1b8   : > { %326 = vrot.lane.b32.xlu1 %v324_v41, %s747_s2 }
 0x226   : > { %v224_v45 = vpop.permute.xlu0 %223 }
 0x227   : > { %v226_v46 = vadd.f32 %v224_v45, %v216_v43 }
 0x229   : > { %549 = vtanh.f32 %v226_v46 }
 0x22a   : > { %v327_v48 = vpop.permute.xlu1 %326 }
 0x22b   : > { %v329_v49 = vadd.f32 %v327_v48, %v319_v47 }
 0x22d   : > { %551 = vtanh.f32 %v329_v49 }
 0x233   : > { %v550_v50 = vpop.eup %549 }
 0x234   : > { %229 = vrot.lane.b32.xlu0 %v550_v50, %s748_s7 }
 0x237   : > { %v552_v51 = vpop.eup %551 }
 0x238   : > { %332 = vrot.lane.b32.xlu1 %v552_v51, %s748_s7 }
 0x2a6   : > { %v230_v52 = vpop.permute.xlu0 %229 }
 0x2a7   : > { %v232_v53 = vmul.f32 %v230_v52, %v210_v35 }
 0x2a9   : > { %337 = vrot.lane.b32.xlu0 %v232_v53, %s747_s2 }
 0x2aa   : > { %v333_v54 = vpop.permute.xlu1 %332 }
 0x2ab   : > { %v335_v55 = vmul.f32 %v333_v54, %v313_v39 }
 0x2ad   : > { %353 = vrot.lane.b32.xlu0 %v226_v46, %s749_s8  ;;  %345 = vrot.lane.b32.xlu1 %v335_v55, %s747_s2 }
 0x2b1   : > { %359 = vrot.lane.b32.xlu1 %v329_v49, %s749_s8 }
 0x31b   : > { %v338_v58 = vpop.permute.xlu0 %337 }
 0x31c   : > { %v340_v59 = vsel %vm125_vm3, %v338_v58, 0.0  ;;  %v351_v60 = vsel %vm125_vm3, %v338_v58, %v729_v10  }
 0x31d   : > { %343 = vst.msk [vmem:[%s341_s0] sm:$0x3] %vm91_vm0, %v340_v59  ;;  %v1005_v10 = vmov %v351_v60  ;;  %364 = vst.msk [vmem:[#allocation2] sm:$0x3] (%p114_p4), %vm91_vm0, %v351_v60 }
 0x31f   : > { %v354_v61 = vpop.permute.xlu0 %353  ;;  %v346_v62 = vpop.permute.xlu1 %345  ;;  %116 = sbr.rel (!%p114_p4) target bundleno = 85 (0x55), region = 81 }
 0x320   : > { %v356_v63 = vsel %vm125_vm3, %v354_v61, %v725_v11   ;;  %v348_v0 = vsel %vm128_vm4, %v346_v62, 0.0  ;;  %v357_v14 = vsel %vm128_vm4, %v346_v62, %v721_v12  }
 0x321   : > { %350 = vst.msk [vmem:[%s349_s24] sm:$0x3] %vm91_vm0, %v348_v0  ;;  %v1003_v12 = vmov %v357_v14  ;;  %v1004_v11 = vmov %v356_v63  ;;  %365 = vst.msk [vmem:[#allocation3] sm:$0x3] (%p114_p4), %vm91_vm0, %v356_v63 }
 0x322   :  { %366 = vst.msk [vmem:[#allocation4] sm:$0x3] (%p114_p4), %vm91_vm0, %v357_v14 }
 0x323   : > { %v360_v15 = vpop.permute.xlu1 %359 }
 0x324   : > { %v362_v16 = vsel %vm128_vm4, %v360_v15, %v717_v13  }
 0x325   : > { %v1002_v13 = vmov %v362_v16  ;;  %367 = vst.msk [vmem:[#allocation5] sm:$0x3] (%p114_p4), %vm91_vm0, %v362_v16 }
 0x326   :  { %652 = shalt.err (!%p649_p9)
}
 0x327   :  { %s653_s18 = scalar_lea.hbm %s1000_s5, 256 }
 0x328   :  { %p654_p10 = scmp.ne.s32.totalorder %s1000_s5, %s653_s18  ;;  %p657_p11 = scmp.lt.u32.totalorder %s653_s18, %s1000_s5 }
 0x32a   :  { %p659_p12 = pnand %p657_p11, %p654_p10 }
 0x32c   :  { %662 = shalt.err (!%p659_p12)
}
 0x32d   :  { %379 = dma.vmem_to_hbm [thread:$0]  %s374_s12, 256, %s1000_s5, [#allocation8], %s737_s9, %s737_s9, %s738_s10  }
 0x32e   :  { %s663_s4 = scalar_lea.vmem %s958_s14, 256  ;;  %p668_p0 = scmp.lt.s32.totalorder %s958_s14, %s958_s14 }
 0x32f   :  { %p664_p13 = scmp.ne.s32.totalorder %s958_s14, %s663_s4  ;;  %p669_p1 = scmp.lt.s32.totalorder %s663_s4, %s663_s4 }
 0x331   :  { %p670_p2 = por %p669_p1, %p668_p0 }
 0x333   :  { %p671_p3 = pnand %p670_p2, %p664_p13 }
 0x335   :  { %674 = shalt.err (!%p671_p3)
}
 0x336   :  { %s675_s2 = scalar_lea.hbm %s1001_s6, 256 }
 0x337   :  { %p676_p4 = scmp.ne.s32.totalorder %s1001_s6, %s675_s2  ;;  %p679_p5 = scmp.lt.u32.totalorder %s675_s2, %s1001_s6 }
 0x339   :  { %p681_p6 = pnand %p679_p5, %p676_p4 }
 0x33b   :  { %684 = shalt.err (!%p681_p6)
}
 0x33c   :  { %395 = dma.vmem_to_hbm [thread:$0]  %s958_s14, 256, %s1001_s6, [#allocation16], %s737_s9, %s737_s9, %s738_s10  }
 0x33d   :  { %711 = dma.done.wait [#allocation8], 256  }
 0x33e   :  { %712 = vsyncadd [#allocation8], 4294967040 }
 0x33f   :  { %713 = dma.done.wait [#allocation16], 256  }
 0x340   :  { %714 = vsyncadd [#allocation16], 4294967040 }
 0x341   :  { %402 = vsyncpa [#allocation7], 1 }
 0x342   :  { %403 = vsyncpa [#allocation10], 1 }
 0x343   :  { %404 = vsyncpa [#allocation13], 1 }
 0x344   :  { %405 = vsyncpa [#allocation8], 1 }
 0x345   :  { %406 = vsyncpa [#allocation16], 1 }

</bundles_post_ra>
